<compile_context>
chip_gen: v6e
topology: v6e:2x2x1
jax: 0.10.0
libtpu: 0.0.40
codegen_flags: <defaults>
</compile_context>

<pallas_src>
import functools

import jax
import jax.numpy as jnp
import numpy as np
from jax.experimental import pallas as pl
from jax.experimental.pallas import tpu as pltpu

_BN_EPS = 1e-5  # _BATCH_NORM_EPSILON
# TODO(synk): training-mode batch statistics / running-stat momentum (_BATCH_NORM_DECAY)
#             are not reproduced; inference-mode (folded) BatchNorm is used.
# TODO(synk): for real ResNet stage sizes (e.g. C=256, H=W=56) add a spatial tile axis
#             with 3x3 halo handling and re-derive NB against v7x's 32 MiB scoped VMEM.


def _identity_block_kernel(x_ref, masks_ref,
                           w1_ref, b1_ref, w2_ref, b2_ref, w3_ref, b3_ref,
                           out_ref, patches_ref, *, width):
    """Processes NB whole images per grid step, batch fused into the lane axis.

    x_ref/out_ref : (C, NB*H*W) f32   channels on sublanes, fused batch*spatial on lanes
    masks_ref     : (8, NB*H*W) f32   per-tap {0,1} edge masks (center tap excluded)
    w1_ref/w3_ref : (C, C)     bf16   1x1 conv weights (C_out, C_in), BN scale folded in
    w2_ref        : (C, 9*C)   bf16   3x3 conv weights (C_out, [ky, kx, C_in]), BN folded
    b*_ref        : (C, 1)     f32    folded BN biases
    patches_ref   : (9*C, NB*H*W) bf16 VMEM scratch (im2col patches)
    """
    C, NL = x_ref.shape
    x = x_ref[...]                                                  # (C, NL) f32

    # --- conv1 (1x1) + bn1 + relu : one MXU matmul (bf16 operands, f32 accumulate) ---
    h1 = jnp.dot(w1_ref[...], x.astype(jnp.bfloat16),
                 preferred_element_type=jnp.float32)
    h1 = jnp.maximum(h1 + b1_ref[...], 0.0)

    # --- conv2 (3x3, stride 1, SAME) + bn2 + relu as a single im2col matmul ---
    # patches[(ky*3+kx)*C + c, p] = h1[c, p + (ky-1)*W + (kx-1)]   (0 outside the image)
    # Rolls wrap across the fused slab, but the masks zero every out-of-image tap, so
    # no cross-image pollution occurs.  Taps are written straight into bf16 scratch.
    tap = 0
    m_idx = 0
    for dy in (-1, 0, 1):
        for dx in (-1, 0, 1):
            shift = dy * width + dx
            if (dy, dx) == (0, 0):
                t = h1
            else:
                t = pltpu.roll(h1, (-shift) % NL, axis=1)           # XLU lane rotation
                t = t * masks_ref[pl.ds(m_idx, 1), :]               # broadcast multiply
                m_idx += 1
            patches_ref[pl.ds(tap * C, C), :] = t.astype(jnp.bfloat16)
            tap += 1

    h2 = jnp.dot(w2_ref[...], patches_ref[...], preferred_element_type=jnp.float32)
    h2 = jnp.maximum(h2 + b2_ref[...], 0.0)

    # --- conv3 (1x1) + bn3, residual add, relu (fused epilogue, f32) ---
    h3 = jnp.dot(w3_ref[...], h2.astype(jnp.bfloat16),
                 preferred_element_type=jnp.float32)
    out_ref[...] = jnp.maximum(h3 + b3_ref[...] + x, 0.0).astype(out_ref.dtype)


def _make_tap_masks(height, width, images_per_step):
    """(8, NB*H*W) f32 {0,1} masks for the 8 non-center 3x3 taps, tiled per image."""
    L = height * width
    flat = np.arange(L)
    row, col = flat // width, flat % width
    ones = np.ones(L, dtype=bool)
    y_ok = {-1: row > 0, 0: ones, 1: row < height - 1}
    x_ok = {-1: col > 0, 0: ones, 1: col < width - 1}
    rows = []
    for dy in (-1, 0, 1):
        for dx in (-1, 0, 1):
            if (dy, dx) == (0, 0):
                continue
            rows.append((y_ok[dy] & x_ok[dx]).astype(np.float32))
    base = np.stack(rows, axis=0)                                   # (8, L)
    return jnp.asarray(np.tile(base, (1, images_per_step)))         # (8, NB*L)


def _choose_images_per_step(n, c, l):
    """Largest NB that divides N, keeps >=2 grid steps (for v7x megacore) when N >= 2,
    and keeps the per-step working set comfortably inside scoped VMEM."""
    per_image = c * l * (4 * 2 * 2 + 9 * 2 + 4 * 4)   # x/out dbl-buffered, bf16 patches, f32 temps
    cap = max(1, (24 << 20) // per_image)
    target = n if n < 2 else max(1, n // 2)
    nb = max(1, min(cap, target))
    while n % nb:
        nb -= 1
    return nb


def identity_block_pallas(x_nchw, kernel_params, images_per_step=None):
    """x_nchw: (N, C, H, W) float32, PyTorch layout. Returns (N, C, H, W)."""
    w1, b1, w2, b2, w3, b3 = kernel_params
    N, C, H, W = x_nchw.shape
    L = H * W

    NB = _choose_images_per_step(N, C, L) if images_per_step is None else images_per_step
    assert N % NB == 0, "images_per_step must evenly divide the batch"
    steps = N // NB
    NL = NB * L

    # Layout plumbing in the wrapper: channels on sublanes, batch fused into lanes.
    x = jnp.transpose(x_nchw.reshape(N, C, L), (1, 0, 2)).reshape(C, N * L)
    masks = _make_tap_masks(H, W, NB)                               # (8, NL)

    kernel = functools.partial(_identity_block_kernel, width=W)
    const = lambda i: (0, 0)

    out = pl.pallas_call(
        kernel,
        out_shape=jax.ShapeDtypeStruct((C, N * L), x_nchw.dtype),
        grid=(steps,),
        in_specs=[pl.BlockSpec((C, NL), lambda i: (0, i)),   # x slab (NB images)
                  pl.BlockSpec((8, NL), const),              # per-tap edge masks
                  pl.BlockSpec((C, C), const),               # w1 (bf16, BN folded)
                  pl.BlockSpec((C, 1), const),               # b1
                  pl.BlockSpec((C, 9 * C), const),           # w2 (bf16, im2col layout)
                  pl.BlockSpec((C, 1), const),               # b2
                  pl.BlockSpec((C, C), const),               # w3 (bf16, BN folded)
                  pl.BlockSpec((C, 1), const)],              # b3
        out_specs=pl.BlockSpec((C, NL), lambda i: (0, i)),
        scratch_shapes=[pltpu.VMEM((9 * C, NL), jnp.bfloat16)],
        compiler_params=pltpu.CompilerParams(dimension_semantics=("parallel",)),
    )(x, masks, w1, b1, w2, b2, w3, b3)

    return jnp.transpose(out.reshape(C, N, L), (1, 0, 2)).reshape(N, C, H, W)


def prepare_params(torch_params):
    """Fold inference-mode BN into the conv weights/biases and lay them out for the kernel:
    1x1 convs -> (C_out, C_in) bf16; 3x3 conv -> (C_out, 9*C_in) bf16 with (ky, kx, c_in)
    tap order matching the kernel's im2col patches; biases -> (C, 1) f32."""
    w1, bn1, w2, bn2, w3, bn3 = torch_params
    c = w1.shape[0]

    def fold(w, bn_p):
        gamma, beta, mean, var = bn_p
        s = gamma / jnp.sqrt(var + _BN_EPS)
        b = beta - mean * s
        return w * s[:, None, None, None], b.reshape(c, 1)

    w1f, b1 = fold(w1, bn1)
    w2f, b2 = fold(w2, bn2)
    w3f, b3 = fold(w3, bn3)
    w1k = w1f[:, :, 0, 0].astype(jnp.bfloat16)                                  # (C, C)
    w2k = jnp.transpose(w2f, (0, 2, 3, 1)).reshape(c, 9 * c).astype(jnp.bfloat16)  # (C, 9C)
    w3k = w3f[:, :, 0, 0].astype(jnp.bfloat16)                                  # (C, C)
    return (w1k, b1, w2k, b2, w3k, b3)


def make_params(key, planes):
    """Random PyTorch-convention params: conv weights (C_out, C_in, kh, kw), BN stats (C,)."""
    c = planes
    ks = list(jax.random.split(key, 15))
    w1 = jax.random.normal(ks[0], (c, c, 1, 1), jnp.float32) / np.sqrt(c)
    w2 = jax.random.normal(ks[1], (c, c, 3, 3), jnp.float32) / np.sqrt(9 * c)
    w3 = jax.random.normal(ks[2], (c, c, 1, 1), jnp.float32) / np.sqrt(c)

    def bn(k0, k1, k2, k3):
        gamma = jax.random.uniform(k0, (c,), jnp.float32, 0.5, 1.5)
        beta = 0.1 * jax.random.normal(k1, (c,), jnp.float32)
        mean = 0.1 * jax.random.normal(k2, (c,), jnp.float32)
        var = jax.random.uniform(k3, (c,), jnp.float32, 0.5, 1.5)
        return (gamma, beta, mean, var)

    return (w1, bn(*ks[3:7]), w2, bn(*ks[7:11]), w3, bn(*ks[11:15]))


def identity_block_reference(x_nchw, torch_params):
    """Pure-JAX (XLA) reference of the PyTorch forward pass (inference-mode BN)."""
    w1, bn1, w2, bn2, w3, bn3 = torch_params

    def conv(h, w):
        return jax.lax.conv_general_dilated(
            h, w, window_strides=(1, 1), padding="SAME",
            dimension_numbers=("NCHW", "OIHW", "NCHW"),
            precision=jax.lax.Precision.HIGHEST)

    def bn(h, p):
        gamma, beta, mean, var = p
        s = (gamma / jnp.sqrt(var + _BN_EPS)).reshape(1, -1, 1, 1)
        b = (beta - mean * gamma / jnp.sqrt(var + _BN_EPS)).reshape(1, -1, 1, 1)
        return h * s + b

    h = jnp.maximum(bn(conv(x_nchw, w1), bn1), 0.0)
    h = jnp.maximum(bn(conv(h, w2), bn2), 0.0)
    h = bn(conv(h, w3), bn3)
    return jnp.maximum(h + x_nchw, 0.0)


if __name__ == "__main__":
    key = jax.random.PRNGKey(0)
    k_x, k_p = jax.random.split(key)

    N, C, H, W = 2, 32, 16, 16       # in_planes == planes (required by the residual add)
    x = jax.random.normal(k_x, (N, C, H, W), jnp.float32)
    torch_params = make_params(k_p, C)
    kparams = prepare_params(torch_params)

    out = jax.block_until_ready(identity_block_pallas(x, kparams))
    ref = jax.block_until_ready(identity_block_reference(x, torch_params))

    # Kernel matmuls use bf16 operands with f32 accumulation; the reference runs full-f32
    # HIGHEST, so allow bf16-level tolerance.
    np.testing.assert_allclose(np.asarray(out), np.asarray(ref), rtol=5e-2, atol=5e-2)

    print("KERNEL_OK")
</pallas_src>

<mosaic_0001>
module attributes {stable_mosaic.version = 11 : i64} {
  func.func @_identity_block_kernel(%arg0: i32, %arg1: memref<32x256xf32, #tpu.memory_space<vmem>>, %arg2: memref<8x256xf32, #tpu.memory_space<vmem>>, %arg3: memref<32x32xbf16, #tpu.memory_space<vmem>>, %arg4: memref<32x1xf32, #tpu.memory_space<vmem>>, %arg5: memref<32x288xbf16, #tpu.memory_space<vmem>>, %arg6: memref<32x1xf32, #tpu.memory_space<vmem>>, %arg7: memref<32x32xbf16, #tpu.memory_space<vmem>>, %arg8: memref<32x1xf32, #tpu.memory_space<vmem>>, %arg9: memref<32x256xf32, #tpu.memory_space<vmem>>, %arg10: memref<288x256xbf16, #tpu.memory_space<vmem>>) attributes {dimension_semantics = [#tpu.dimension_semantics<parallel>], iteration_bounds = array<i64: 2>, scalar_prefetch = 0 : i64, scratch_operands = 1 : i64, tpu.core_type = #tpu.core_type<tc>, window_params = [{transform_indices = @transform_0, window_bounds = array<i64: 32, 256>}, {pipeline_mode = #tpu.pipeline_mode<synchronous>, transform_indices = @transform_1, window_bounds = array<i64: 8, 256>}, {pipeline_mode = #tpu.pipeline_mode<synchronous>, transform_indices = @transform_2, window_bounds = array<i64: 32, 32>}, {pipeline_mode = #tpu.pipeline_mode<synchronous>, transform_indices = @transform_3, window_bounds = array<i64: 32, 1>}, {pipeline_mode = #tpu.pipeline_mode<synchronous>, transform_indices = @transform_4, window_bounds = array<i64: 32, 288>}, {pipeline_mode = #tpu.pipeline_mode<synchronous>, transform_indices = @transform_5, window_bounds = array<i64: 32, 1>}, {pipeline_mode = #tpu.pipeline_mode<synchronous>, transform_indices = @transform_6, window_bounds = array<i64: 32, 32>}, {pipeline_mode = #tpu.pipeline_mode<synchronous>, transform_indices = @transform_7, window_bounds = array<i64: 32, 1>}, {transform_indices = @transform_8, window_bounds = array<i64: 32, 256>}]} {
    %c0 = arith.constant 0 : index
    %c0_0 = arith.constant 0 : index
    %0 = vector.load %arg1[%c0, %c0_0] : memref<32x256xf32, #tpu.memory_space<vmem>>, vector<32x256xf32>
    %c0_1 = arith.constant 0 : index
    %c0_2 = arith.constant 0 : index
    %1 = vector.load %arg3[%c0_1, %c0_2] : memref<32x32xbf16, #tpu.memory_space<vmem>>, vector<32x32xbf16>
    %2 = arith.truncf %0 : vector<32x256xf32> to vector<32x256xbf16>
    %cst = arith.constant dense<0.000000e+00> : vector<32x256xf32>
    %3 = tpu.matmul %1, %2, %cst {dimension_numbers = #tpu.dot_dimension_numbers<[1], [0], [0], [1], [0, 0, 1, 1], [], []>} : vector<32x32xbf16>, vector<32x256xbf16>, vector<32x256xf32> -> vector<32x256xf32>
    %c0_3 = arith.constant 0 : index
    %c0_4 = arith.constant 0 : index
    %4 = vector.load %arg4[%c0_3, %c0_4] : memref<32x1xf32, #tpu.memory_space<vmem>>, vector<32x1xf32>
    %5 = vector.broadcast %4 : vector<32x1xf32> to vector<32x256xf32>
    %6 = arith.addf %3, %5 : vector<32x256xf32>
    %cst_5 = arith.constant 0.000000e+00 : f32
    %7 = vector.broadcast %cst_5 : f32 to vector<32x256xf32>
    %8 = arith.maximumf %6, %7 : vector<32x256xf32>
    %c17_i32 = arith.constant 17 : i32
    %9 = tpu.dynamic_rotate %8 by %c17_i32 dim 1 : vector<32x256xf32>, i32 -> vector<32x256xf32>
    %c0_6 = arith.constant 0 : index
    %c0_7 = arith.constant 0 : index
    %10 = vector.load %arg2[%c0_6, %c0_7] : memref<8x256xf32, #tpu.memory_space<vmem>>, vector<1x256xf32>
    %11 = vector.broadcast %10 : vector<1x256xf32> to vector<32x256xf32>
    %12 = arith.mulf %9, %11 : vector<32x256xf32>
    %13 = arith.truncf %12 : vector<32x256xf32> to vector<32x256xbf16>
    %c0_8 = arith.constant 0 : index
    %c0_9 = arith.constant 0 : index
    %14 = vector.load %arg10[%c0_8, %c0_9] : memref<288x256xbf16, #tpu.memory_space<vmem>>, vector<32x256xbf16>
    tpu.vector_store %arg10[%c0_8, %c0_9], %13 {strides = array<i32>} : memref<288x256xbf16, #tpu.memory_space<vmem>>, vector<32x256xbf16>,
    %c16_i32 = arith.constant 16 : i32
    %15 = tpu.dynamic_rotate %8 by %c16_i32 dim 1 : vector<32x256xf32>, i32 -> vector<32x256xf32>
    %c1 = arith.constant 1 : index
    %c0_10 = arith.constant 0 : index
    %16 = vector.load %arg2[%c1, %c0_10] : memref<8x256xf32, #tpu.memory_space<vmem>>, vector<1x256xf32>
    %17 = vector.broadcast %16 : vector<1x256xf32> to vector<32x256xf32>
    %18 = arith.mulf %15, %17 : vector<32x256xf32>
    %19 = arith.truncf %18 : vector<32x256xf32> to vector<32x256xbf16>
    %c32 = arith.constant 32 : index
    %c0_11 = arith.constant 0 : index
    %20 = vector.load %arg10[%c32, %c0_11] : memref<288x256xbf16, #tpu.memory_space<vmem>>, vector<32x256xbf16>
    tpu.vector_store %arg10[%c32, %c0_11], %19 {strides = array<i32>} : memref<288x256xbf16, #tpu.memory_space<vmem>>, vector<32x256xbf16>,
    %c15_i32 = arith.constant 15 : i32
    %21 = tpu.dynamic_rotate %8 by %c15_i32 dim 1 : vector<32x256xf32>, i32 -> vector<32x256xf32>
    %c2 = arith.constant 2 : index
    %c0_12 = arith.constant 0 : index
    %22 = vector.load %arg2[%c2, %c0_12] : memref<8x256xf32, #tpu.memory_space<vmem>>, vector<1x256xf32>
    %23 = vector.broadcast %22 : vector<1x256xf32> to vector<32x256xf32>
    %24 = arith.mulf %21, %23 : vector<32x256xf32>
    %25 = arith.truncf %24 : vector<32x256xf32> to vector<32x256xbf16>
    %c64 = arith.constant 64 : index
    %c0_13 = arith.constant 0 : index
    %26 = vector.load %arg10[%c64, %c0_13] : memref<288x256xbf16, #tpu.memory_space<vmem>>, vector<32x256xbf16>
    tpu.vector_store %arg10[%c64, %c0_13], %25 {strides = array<i32>} : memref<288x256xbf16, #tpu.memory_space<vmem>>, vector<32x256xbf16>,
    %c1_i32 = arith.constant 1 : i32
    %27 = tpu.dynamic_rotate %8 by %c1_i32 dim 1 : vector<32x256xf32>, i32 -> vector<32x256xf32>
    %c3 = arith.constant 3 : index
    %c0_14 = arith.constant 0 : index
    %28 = vector.load %arg2[%c3, %c0_14] : memref<8x256xf32, #tpu.memory_space<vmem>>, vector<1x256xf32>
    %29 = vector.broadcast %28 : vector<1x256xf32> to vector<32x256xf32>
    %30 = arith.mulf %27, %29 : vector<32x256xf32>
    %31 = arith.truncf %30 : vector<32x256xf32> to vector<32x256xbf16>
    %c96 = arith.constant 96 : index
    %c0_15 = arith.constant 0 : index
    %32 = vector.load %arg10[%c96, %c0_15] : memref<288x256xbf16, #tpu.memory_space<vmem>>, vector<32x256xbf16>
    tpu.vector_store %arg10[%c96, %c0_15], %31 {strides = array<i32>} : memref<288x256xbf16, #tpu.memory_space<vmem>>, vector<32x256xbf16>,
    %33 = arith.truncf %8 : vector<32x256xf32> to vector<32x256xbf16>
    %c128 = arith.constant 128 : index
    %c0_16 = arith.constant 0 : index
    %34 = vector.load %arg10[%c128, %c0_16] : memref<288x256xbf16, #tpu.memory_space<vmem>>, vector<32x256xbf16>
    tpu.vector_store %arg10[%c128, %c0_16], %33 {strides = array<i32>} : memref<288x256xbf16, #tpu.memory_space<vmem>>, vector<32x256xbf16>,
    %c255_i32 = arith.constant 255 : i32
    %35 = tpu.dynamic_rotate %8 by %c255_i32 dim 1 : vector<32x256xf32>, i32 -> vector<32x256xf32>
    %c4 = arith.constant 4 : index
    %c0_17 = arith.constant 0 : index
    %36 = vector.load %arg2[%c4, %c0_17] : memref<8x256xf32, #tpu.memory_space<vmem>>, vector<1x256xf32>
    %37 = vector.broadcast %36 : vector<1x256xf32> to vector<32x256xf32>
    %38 = arith.mulf %35, %37 : vector<32x256xf32>
    %39 = arith.truncf %38 : vector<32x256xf32> to vector<32x256xbf16>
    %c160 = arith.constant 160 : index
    %c0_18 = arith.constant 0 : index
    %40 = vector.load %arg10[%c160, %c0_18] : memref<288x256xbf16, #tpu.memory_space<vmem>>, vector<32x256xbf16>
    tpu.vector_store %arg10[%c160, %c0_18], %39 {strides = array<i32>} : memref<288x256xbf16, #tpu.memory_space<vmem>>, vector<32x256xbf16>,
    %c241_i32 = arith.constant 241 : i32
    %41 = tpu.dynamic_rotate %8 by %c241_i32 dim 1 : vector<32x256xf32>, i32 -> vector<32x256xf32>
    %c5 = arith.constant 5 : index
    %c0_19 = arith.constant 0 : index
    %42 = vector.load %arg2[%c5, %c0_19] : memref<8x256xf32, #tpu.memory_space<vmem>>, vector<1x256xf32>
    %43 = vector.broadcast %42 : vector<1x256xf32> to vector<32x256xf32>
    %44 = arith.mulf %41, %43 : vector<32x256xf32>
    %45 = arith.truncf %44 : vector<32x256xf32> to vector<32x256xbf16>
    %c192 = arith.constant 192 : index
    %c0_20 = arith.constant 0 : index
    %46 = vector.load %arg10[%c192, %c0_20] : memref<288x256xbf16, #tpu.memory_space<vmem>>, vector<32x256xbf16>
    tpu.vector_store %arg10[%c192, %c0_20], %45 {strides = array<i32>} : memref<288x256xbf16, #tpu.memory_space<vmem>>, vector<32x256xbf16>,
    %c240_i32 = arith.constant 240 : i32
    %47 = tpu.dynamic_rotate %8 by %c240_i32 dim 1 : vector<32x256xf32>, i32 -> vector<32x256xf32>
    %c6 = arith.constant 6 : index
    %c0_21 = arith.constant 0 : index
    %48 = vector.load %arg2[%c6, %c0_21] : memref<8x256xf32, #tpu.memory_space<vmem>>, vector<1x256xf32>
    %49 = vector.broadcast %48 : vector<1x256xf32> to vector<32x256xf32>
    %50 = arith.mulf %47, %49 : vector<32x256xf32>
    %51 = arith.truncf %50 : vector<32x256xf32> to vector<32x256xbf16>
    %c224 = arith.constant 224 : index
    %c0_22 = arith.constant 0 : index
    %52 = vector.load %arg10[%c224, %c0_22] : memref<288x256xbf16, #tpu.memory_space<vmem>>, vector<32x256xbf16>
    tpu.vector_store %arg10[%c224, %c0_22], %51 {strides = array<i32>} : memref<288x256xbf16, #tpu.memory_space<vmem>>, vector<32x256xbf16>,
    %c239_i32 = arith.constant 239 : i32
    %53 = tpu.dynamic_rotate %8 by %c239_i32 dim 1 : vector<32x256xf32>, i32 -> vector<32x256xf32>
    %c7 = arith.constant 7 : index
    %c0_23 = arith.constant 0 : index
    %54 = vector.load %arg2[%c7, %c0_23] : memref<8x256xf32, #tpu.memory_space<vmem>>, vector<1x256xf32>
    %55 = vector.broadcast %54 : vector<1x256xf32> to vector<32x256xf32>
    %56 = arith.mulf %53, %55 : vector<32x256xf32>
    %57 = arith.truncf %56 : vector<32x256xf32> to vector<32x256xbf16>
    %c256 = arith.constant 256 : index
    %c0_24 = arith.constant 0 : index
    %58 = vector.load %arg10[%c256, %c0_24] : memref<288x256xbf16, #tpu.memory_space<vmem>>, vector<32x256xbf16>
    tpu.vector_store %arg10[%c256, %c0_24], %57 {strides = array<i32>} : memref<288x256xbf16, #tpu.memory_space<vmem>>, vector<32x256xbf16>,
    %c0_25 = arith.constant 0 : index
    %c0_26 = arith.constant 0 : index
    %59 = vector.load %arg5[%c0_25, %c0_26] : memref<32x288xbf16, #tpu.memory_space<vmem>>, vector<32x288xbf16>
    %c0_27 = arith.constant 0 : index
    %c0_28 = arith.constant 0 : index
    %60 = vector.load %arg10[%c0_27, %c0_28] : memref<288x256xbf16, #tpu.memory_space<vmem>>, vector<288x256xbf16>
    %cst_29 = arith.constant dense<0.000000e+00> : vector<32x256xf32>
    %61 = tpu.matmul %59, %60, %cst_29 {dimension_numbers = #tpu.dot_dimension_numbers<[1], [0], [0], [1], [0, 0, 1, 1], [], []>} : vector<32x288xbf16>, vector<288x256xbf16>, vector<32x256xf32> -> vector<32x256xf32>
    %c0_30 = arith.constant 0 : index
    %c0_31 = arith.constant 0 : index
    %62 = vector.load %arg6[%c0_30, %c0_31] : memref<32x1xf32, #tpu.memory_space<vmem>>, vector<32x1xf32>
    %63 = vector.broadcast %62 : vector<32x1xf32> to vector<32x256xf32>
    %64 = arith.addf %61, %63 : vector<32x256xf32>
    %cst_32 = arith.constant 0.000000e+00 : f32
    %65 = vector.broadcast %cst_32 : f32 to vector<32x256xf32>
    %66 = arith.maximumf %64, %65 : vector<32x256xf32>
    %c0_33 = arith.constant 0 : index
    %c0_34 = arith.constant 0 : index
    %67 = vector.load %arg7[%c0_33, %c0_34] : memref<32x32xbf16, #tpu.memory_space<vmem>>, vector<32x32xbf16>
    %68 = arith.truncf %66 : vector<32x256xf32> to vector<32x256xbf16>
    %cst_35 = arith.constant dense<0.000000e+00> : vector<32x256xf32>
    %69 = tpu.matmul %67, %68, %cst_35 {dimension_numbers = #tpu.dot_dimension_numbers<[1], [0], [0], [1], [0, 0, 1, 1], [], []>} : vector<32x32xbf16>, vector<32x256xbf16>, vector<32x256xf32> -> vector<32x256xf32>
    %c0_36 = arith.constant 0 : index
    %c0_37 = arith.constant 0 : index
    %70 = vector.load %arg8[%c0_36, %c0_37] : memref<32x1xf32, #tpu.memory_space<vmem>>, vector<32x1xf32>
    %71 = vector.broadcast %70 : vector<32x1xf32> to vector<32x256xf32>
    %72 = arith.addf %69, %71 : vector<32x256xf32>
    %73 = arith.addf %72, %0 : vector<32x256xf32>
    %cst_38 = arith.constant 0.000000e+00 : f32
    %74 = vector.broadcast %cst_38 : f32 to vector<32x256xf32>
    %75 = arith.maximumf %73, %74 : vector<32x256xf32>
    %c0_39 = arith.constant 0 : index
    %c0_40 = arith.constant 0 : index
    %76 = vector.load %arg9[%c0_39, %c0_40] : memref<32x256xf32, #tpu.memory_space<vmem>>, vector<32x256xf32>
    tpu.vector_store %arg9[%c0_39, %c0_40], %75 {strides = array<i32>} : memref<32x256xf32, #tpu.memory_space<vmem>>, vector<32x256xf32>,
    return
  }
  func.func @transform_0(%arg0: i32) -> (i32, i32) {
    %c0_i32 = arith.constant 0 : i32
    %c0_i32_0 = arith.constant 0 : i32
    return %c0_i32, %arg0 : i32, i32
  }
  func.func @transform_1(%arg0: i32) -> (i32, i32) {
    %c0_i32 = arith.constant 0 : i32
    %c0_i32_0 = arith.constant 0 : i32
    %c0_i32_1 = arith.constant 0 : i32
    return %c0_i32, %c0_i32_0 : i32, i32
  }
  func.func @transform_2(%arg0: i32) -> (i32, i32) {
    %c0_i32 = arith.constant 0 : i32
    %c0_i32_0 = arith.constant 0 : i32
    %c0_i32_1 = arith.constant 0 : i32
    return %c0_i32, %c0_i32_0 : i32, i32
  }
  func.func @transform_3(%arg0: i32) -> (i32, i32) {
    %c0_i32 = arith.constant 0 : i32
    %c0_i32_0 = arith.constant 0 : i32
    %c0_i32_1 = arith.constant 0 : i32
    return %c0_i32, %c0_i32_0 : i32, i32
  }
  func.func @transform_4(%arg0: i32) -> (i32, i32) {
    %c0_i32 = arith.constant 0 : i32
    %c0_i32_0 = arith.constant 0 : i32
    %c0_i32_1 = arith.constant 0 : i32
    return %c0_i32, %c0_i32_0 : i32, i32
  }
  func.func @transform_5(%arg0: i32) -> (i32, i32) {
    %c0_i32 = arith.constant 0 : i32
    %c0_i32_0 = arith.constant 0 : i32
    %c0_i32_1 = arith.constant 0 : i32
    return %c0_i32, %c0_i32_0 : i32, i32
  }
  func.func @transform_6(%arg0: i32) -> (i32, i32) {
    %c0_i32 = arith.constant 0 : i32
    %c0_i32_0 = arith.constant 0 : i32
    %c0_i32_1 = arith.constant 0 : i32
    return %c0_i32, %c0_i32_0 : i32, i32
  }
  func.func @transform_7(%arg0: i32) -> (i32, i32) {
    %c0_i32 = arith.constant 0 : i32
    %c0_i32_0 = arith.constant 0 : i32
    %c0_i32_1 = arith.constant 0 : i32
    return %c0_i32, %c0_i32_0 : i32, i32
  }
  func.func @transform_8(%arg0: i32) -> (i32, i32) {
    %c0_i32 = arith.constant 0 : i32
    %c0_i32_0 = arith.constant 0 : i32
    return %c0_i32, %arg0 : i32, i32
  }
}

</mosaic_0001>

<bundles_post_ra>
// kernel: tpu_custom_call.1
= control target key start
LH: loop header
LB: loop body
LE: loop exit
PB: predicated region body
PF: predicated region fallthrough
CT: control target
= control target key end

     0   :  { %13 = vsyncpa [#allocation4], 0  ;;  %s2887_s0 = inlined_call_operand.hbm [shape: f32[32,512], index: 0, kind: input, shape index: {}]   ;;  %s2888_s1 = inlined_call_operand.vmem [shape: f32[8,256], index: 1, kind: input, shape index: {}]   ;;  %s2889_s2 = inlined_call_operand.vmem [shape: bf16[32,32], index: 2, kind: input, shape index: {}]   ;;  %s2890_s3 = inlined_call_operand.vmem [shape: f32[32,1], index: 3, kind: input, shape index: {}]   ;;  %s2891_s4 = inlined_call_operand.vmem [shape: bf16[32,288], index: 4, kind: input, shape index: {}]   ;;  %s2892_s5 = inlined_call_operand.vmem [shape: f32[32,1], index: 5, kind: input, shape index: {}]   ;;  %s2893_s6 = inlined_call_operand.vmem [shape: bf16[32,32], index: 6, kind: input, shape index: {}]   ;;  %s2894_s7 = inlined_call_operand.vmem [shape: f32[32,1], index: 7, kind: input, shape index: {}]   ;;  %s2895_s8 = inlined_call_operand.hbm [shape: f32[32,512], index: 8, kind: output, shape index: {}]  }
   0x1   :  { %15 = vsyncpa [#allocation4 + $0x1], 0 }
   0x2   :  { %16 = vsyncpa [#allocation5], 0 }
   0x3   :  { %18 = vsyncpa [#allocation5 + $0x1], 0  ;;  %s2096_s27 = smov 0   ;;  %s2098_s28 = smov 0  }
   0x4   :  { %s2100_s29 = smov 0   ;;  %s2102_s30 = smov 0  }
   0x5 LB: > { %s2117_s9 = sadd.s32 4294967295, %s2033_s30   ;;  %s1676_s10 = sadd.s32 4294967294, %s2033_s30   ;;  %s2033_s30 = sphi %s2102_s30, %s2937_s30   ;;  %s2029_s29 = sphi %s2100_s29, %s2936_s29   ;;  %s2025_s28 = sphi %s2098_s28, %s2935_s28   ;;  %s2021_s27 = sphi %s2096_s27, %s2934_s27  }
   0x6   : > { %s2121_s11 = sadd.s32 1, %s2033_s30   ;;  %s31_s12 = sadd.s32 1, %s2029_s29 }
   0x7   : > { %s28_s13 = ssub.s32 %s2033_s30, %s2121_s11  ;;  %p38_p0 = scmp.ne.s32.totalorder %s2029_s29, %s2025_s28 }
   0x8   : > { %p29_p1 = scmp.eq.s32.totalorder %s28_s13, 0  ;;  %p39_p2 = scmp.eq.s32.totalorder %s2033_s30, 0 }
   0x9   : > { %p44_p3 = scmp.ne.s32.totalorder %s2025_s28, %s2021_s27  ;;  %p45_p4 = scmp.eq.s32.totalorder %s2117_s9, 0 }
   0xa   : > { %s2133_s14 = scalar_select %p29_p1, %s2029_s29, %s31_s12  }
   0xb   : > { %p2135_p5 = por %p39_p2, %p38_p0  ;;  %p2139_p6 = por %p45_p4, %p44_p3 }
   0xc   : > { %2904 = sst [smem:[#allocation9_spill]] %s2133_s14  ;;  %p215_p7 = scmp.eq.s32.totalorder %s2117_s9, 1 }
   0xd   : > { %s2906_s16 = scalar_select %p2139_p6, 1, 0 }
   0xe   : > { %p221_p8 = scmp.eq.s32.totalorder %s1676_s10, 1  ;;  %p1871_p10 = scmp.lt.s32.totalorder %s2033_s30, 2 }
   0xf   : > { %p2146_p11 = por %p215_p7, %p38_p0  ;;  %s262_s19 = sand.u32 1, %s2029_s29  }
  0x10   : > { %p2150_p12 = por %p221_p8, %p44_p3  ;;  %s1785_s20 = sshll.u32 %s2033_s30, 8 }
  0x11   : > { %s2907_s17 = scalar_select %p2146_p11, 1, 0 }
  0x12   : > { %s2908_s18 = scalar_select %p2150_p12, 1, 0 }
  0x13   : > { %s1679_s21 = sshll.u32 %s262_s19, 6  ;;  %s2159_s24 = scalar_lea.hbm %s2887_s0, %s1785_s20 }
  0x14   : > { %s266_s25 = scalar_lea.vmem [#allocation3], %s1679_s21  ;;  %p2163_p13 = pnand %p1871_p10, %p2135_p5 }
  0x15   : > { %s273_s26 = sshll.u32 %s266_s25, 4  ;;  %s2170_s12 = scalar_lea.sflag [#allocation4], %s262_s19  ;;  %s2167_s26 = int_to_ptr.vmem [resolvable:$true] %s273_s26 }
  0x16   : > { %s1941_s13 = scalar_lea.hbm %s2159_s24, 1024  ;;  %p1943_p2 = pneg %p2163_p13 }
  0x17   : > { %p1942_p1 = scmp.ne.s32.totalorder %s2159_s24, %s1941_s13  ;;  %s1946_s15 = scalar_lea.hbm %s2887_s0, 2048 }
  0x18   : > { %p1947_p5 = scmp.lt.s32.totalorder %s2159_s24, %s2887_s0  ;;  %p1948_p7 = scmp.lt.s32.totalorder %s1946_s15, %s1941_s13 }
  0x19   : > { %p1944_p3 = pnand %p1943_p2, %p1942_p1 }
  0x1a   : > { %p1949_p8 = por %p1948_p7, %p1947_p5 }
  0x1b   : > { %p1945_p4 = pneg %p1944_p3 }
  0x1d   : > { %p1950_p10 = pnand %p1949_p8, %p1945_p4 }
  0x1f   : > { %1953 = shalt.err (!%p1950_p10)
}
  0x20   : > { %s1954_s19 = scalar_lea.vmem %s2167_s26, 1024  ;;  %s2035_s25 = smov [#allocation3]  }
  0x21   : > { %p1955_p9 = scmp.ne.s32.totalorder %s2167_s26, %s1954_s19  ;;  %s1959_s14 = sshll.u32 %s2035_s25, 4  ;;  %s1960_s14 = int_to_ptr.vmem [resolvable:$false] %s1959_s14 }
  0x22   : > { %s1961_s20 = scalar_lea.vmem %s1960_s14, 2048  ;;  %p1962_p3 = scmp.lt.s32.totalorder %s2167_s26, %s1960_s14 }
  0x23   : > { %p1957_p0 = pnand %p1955_p9, %p1943_p2  ;;  %p1963_p12 = scmp.lt.s32.totalorder %s1961_s20, %s1954_s19 }
  0x25   : > { %p1958_p1 = pneg %p1957_p0  ;;  %p1964_p11 = por %p1963_p12, %p1962_p3 }
  0x27   : > { %p1965_p6 = pnand %p1964_p11, %p1958_p1 }
  0x29   : > { %1968 = shalt.err (!%p1965_p6)
}
  0x2a   : > { %s2036_s13 = smov 512   ;;  %s2037_s21 = smov 256  }
  0x2b   : > { %s2038_s15 = smov 16   ;;  %p281_p9 = scmp.lt.s32.totalorder %s2033_s30, 3 }
  0x2c   : > { %1866 = dma.hbm_to_vmem [thread:$0]  (!%p2163_p13), %s2159_s24, 1024, %s2167_s26, %s2170_s12, %s2036_s13, %s2037_s21, %s2038_s15  }
  0x2d   : > { %p2910_p0 = scmp.ge.s32.totalorder %s2033_s30, 1 }
  0x2f   : > { %p282_p2 = pnand %p2910_p0, %p281_p9 }
  0x31   : > { %285 = sbr.rel (%p282_p2) target bundleno = 966 (0x3c6), region = 52 }
  0x36   : > { %s2195_s14 = sand.u32 1, %s2025_s28   ;;  %p2911_p6 = scmp.ne.s32.totalorder %s2906_s16, 0 }
  0x37   : > { %s1683_s22 = sshll.u32 %s2195_s14, 6  ;;  %s288_s23 = scalar_lea.sflag [#allocation4], %s2195_s14 }
  0x38   : > { %s2201_s19 = scalar_lea.vmem [#allocation3], %s1683_s22 }
  0x39   : > { %2012 = dma.done.wait (%p2911_p6), %s288_s23, 1024  }
  0x3a   : > { %2014 = vsyncadd (%p2911_p6), %s288_s23, 4294966272  ;;  %v2898_v0 = vmov 0   ;;  %v332_v1 = vld [vmem:[%s2201_s19 + $0x28] sm:$0xff]  ;;  %v334_v2 = vld [vmem:[%s2201_s19 + $0x38] sm:$0xff]  ;;  %vm377_vm0 = vcmask 261120   ;;  %s2040_s24 = smov 1   ;;  %v461_v53 = vlaneseq }
  0x3b   : > { %416 = vmatprep.mubr.bf16.mxu0 %v2898_v0  ;;  %1920 = vset.pattern.permute.xlu1 %v2898_v0  ;;  %v331_v3 = vld [vmem:[%s2201_s19 + $0x20] sm:$0xff]  ;;  %v342_v4 = vpack.c.bf16 %v334_v2, %v332_v1  ;;  %v333_v5 = vld [vmem:[%s2201_s19 + $0x30] sm:$0xff]  ;;  %v328_v6 = vld [vmem:[%s2201_s19 + $0x8] sm:$0xff]  ;;  %s2041_s26 = smov 15   ;;  %s2042_s10 = smov 16  }
  0x3c   : > { %1919 = vset.pattern.permute.xlu0 %v2898_v0  ;;  %v330_v7 = vld [vmem:[%s2201_s19 + $0x18] sm:$0xff]  ;;  %v341_v8 = vpack.c.bf16 %v333_v5, %v331_v3  ;;  %v327_v10 = vld [vmem:[%s2201_s19] sm:$0xff]  ;;  %v329_v11 = vld [vmem:[%s2201_s19 + $0x10] sm:$0xff]  ;;  %s2043_s12 = smov 17   ;;  %s2044_s25 = smov 112   ;;  %v475_v57 = vshrl.u32 %v461_v53, 7 }
  0x3d   : > { %v340_v9 = vpack.c.bf16 %v330_v7, %v328_v6  ;;  %396 = vmatprep.subr.bf16.mxu0 %v342_v4  ;;  %v339_v12 = vpack.c.bf16 %v329_v11, %v327_v10  ;;  %v343_v13 = vld [vmem:[%s2890_s3] sm:$0xff]  ;;  %v344_v15 = vld [vmem:[%s2890_s3 + $0x8] sm:$0xff]  ;;  %v345_v16 = vld [vmem:[%s2890_s3 + $0x10] sm:$0xff]  ;;  %s2045_s20 = smov 113   ;;  %s2046_s13 = smov 127   ;;  %v2384_v62 = vand.u32 127, %v461_v53 }
  0x3e   : > { %397 = vmatpush1.bf16.msra.mxu0 %v341_v8  ;;  %v1921_v14 = vld [vmem:[%s2889_s2] sm:$0xff]   ;;  %349 = vperm.xlu1 %1920, %v343_v13   ;;  %v346_v17 = vld [vmem:[%s2890_s3 + $0x18] sm:$0xff]  ;;  %v1922_v18 = vld [vmem:[%s2889_s2 + $0x8] sm:$0xff]   ;;  %s2047_s21 = smov 111   ;;  %v2386_v63 = vsub.s32 0, %v475_v57  ;;  %v2418_v10 = vsub.s32 1, %v475_v57 }
  0x3f   : > { %398 = vmatprep.subr.bf16.mxu0 %v340_v9  ;;  %359 = vperm.xlu0 %1919, %v345_v16   ;;  %v1925_v50 = vld [vmem:[%s2891_s4 + $0x4] ss:$12 sps:$4 sm:$0xff]   ;;  %v1113_v58 = vld [vmem:[%s2892_s5 + $0x18] sm:$0xff]  ;;  %v2391_v1 = vld [vmem:[%s2888_s1 + $0x3] ss:$8 sm:$0x3] }
  0x40   : > { %1382 = vmatprep.mubr.bf16.mxu1 %v1925_v50  ;;  %v1112_v54 = vld [vmem:[%s2892_s5 + $0x10] sm:$0xff]  ;;  %v1110_v59 = vld [vmem:[%s2892_s5] sm:$0xff]  ;;  %v1111_v2 = vld [vmem:[%s2892_s5 + $0x8] sm:$0xff]  ;;  %vm684_vm1 = vcmp.lt.s32.totalorder %v2384_v62, 1  ;;  %v2406_v6 = vrot.slane %v2391_v1, %v2386_v63  ;;  %vm610_vm2 = vcmp.lt.s32.totalorder %v2384_v62, 15  ;;  %vm536_vm3 = vcmp.lt.s32.totalorder %v2384_v62, 16 }
  0x41   : > { %v1472_v3 = vld [vmem:[%s2894_s7] sm:$0xff]  ;;  %v1473_v9 = vld [vmem:[%s2894_s7 + $0x8] sm:$0xff]  ;;  %v1474_v13 = vld [vmem:[%s2894_s7 + $0x10] sm:$0xff]  ;;  %vm463_vm4 = vcmp.lt.s32.totalorder %v2384_v62, 17  ;;  %vm934_vm5 = vcmp.lt.s32.totalorder %v2384_v62, 112  ;;  %vm860_vm6 = vcmp.lt.s32.totalorder %v2384_v62, 113 }
  0x42   : > { %399 = vmatpush1.bf16.msra.mxu0 %v339_v12  ;;  %354 = vperm.xlu1 %1920, %v344_v15   ;;  %v1698_v8 = vld [vmem:[%s2888_s1 + $0x2] ss:$8 sm:$0x3]  ;;  %vm786_vm7 = vcmp.lt.s32.totalorder %v2384_v62, 127  ;;  %vm1008_vm8 = vcmp.lt.s32.totalorder %v2384_v62, 111  ;;  %p2930_p12 = scmp.ne.s32.totalorder %s2907_s17, 0 }
  0x43   : > { %364 = vperm.xlu0 %1919, %v346_v17   ;;  %v2437_v17 = vrot.slane %v1698_v8, %v2386_v63 }
  0x45   : > { %1687 = vmatmul.mubr.msk.bf16.vlgmr.msra.gmra.mxu0 %vm377_vm0, %v1921_v14 }
  0x46   : > { %426 = vmatprep.mubr.bf16.mxu0 %v2898_v0 }
  0x4d   : > { %1688 = vmatmul.mubr.msk.bf16.gmra.mxu0 %vm377_vm0, %v1922_v18  ;;  %v2440_v18 = vrot.slane %v1698_v8, %v2418_v10 }
  0x4e   : > { %1435 = vmatprep.mubr.bf16.mxu0 %v2898_v0 }
  0xb9   : > { %v350_v19 = vpop.permute.xlu1 %349 }
  0xba   : > { %v360_v34 = vpop.permute.xlu0 %359 }
  0xbd   : > { %v355_v24 = vpop.permute.xlu1 %354 }
  0xbe   : > { %v365_v37 = vpop.permute.xlu0 %364 }
 0x105   : > { %v418_v20 = vpop.f32.mrf.mxu0 }
 0x106   : > { %v419_v21 = vadd.f32 %v418_v20, %v350_v19 }
 0x107   : > { %v420_v22 = vpop.f32.mrf.mxu0 }
 0x108   : > { %v2240_v23 = vmax.f32 %v419_v21, 0.0  ;;  %v421_v28 = vadd.f32 %v420_v22, %v350_v19  ;;  %v1693_v19 = vld [vmem:[%s2888_s1 + $0x1] ss:$8 sm:$0x3]  ;;  %v1475_v22 = vld [vmem:[%s2894_s7 + $0x18] sm:$0xff] }
 0x109   : > { %v422_v25 = vpop.f32.mrf.mxu0 }
 0x10a   : > { %2912 = vst [vmem:[#allocation10_spill] sm:$0xff] %v2240_v23  ;;  %v423_v26 = vadd.f32 %v422_v25, %v355_v24  ;;  %668 = vrot.lane.b32.xlu0 %v2240_v23, %s2040_s24  ;;  %v2262_v30 = vmax.f32 %v421_v28, 0.0 }
 0x10b   : > { %v424_v29 = vpop.f32.mrf.mxu0 }
 0x10c   : > { %v2244_v27 = vmax.f32 %v423_v26, 0.0  ;;  %2914 = vst [vmem:[#allocation12_spill] sm:$0xff] %v2262_v30  ;;  %v425_v31 = vadd.f32 %v424_v29, %v355_v24 }
 0x10d   : > { %v428_v33 = vpop.f32.mrf.mxu0 }
 0x10e   : > { %2913 = vst [vmem:[#allocation11_spill] sm:$0xff] %v2244_v27  ;;  %670 = vrot.lane.b32.xlu1 %v2244_v27, %s2040_s24  ;;  %594 = vrot.lane.b32.xlu0 %v2240_v23, %s2041_s26  ;;  %v2268_v32 = vmax.f32 %v425_v31, 0.0  ;;  %v429_v35 = vadd.f32 %v428_v33, %v360_v34  ;;  %v2460_v31 = vrot.slane %v1693_v19, %v2386_v63 }
 0x10f   : > { %v430_v36 = vpop.f32.mrf.mxu0  ;;  %v2463_v33 = vrot.slane %v1693_v19, %v2418_v10 }
 0x110   : > { %2915 = vst [vmem:[#allocation13_spill] sm:$0xff] %v2268_v32  ;;  %v2282_v38 = vmax.f32 %v429_v35, 0.0  ;;  %v431_v42 = vadd.f32 %v430_v36, %v360_v34 }
 0x111   : > { %v432_v39 = vpop.f32.mrf.mxu0 }
 0x112   : > { %596 = vrot.lane.b32.xlu1 %v2244_v27, %s2041_s26  ;;  %520 = vrot.lane.b32.xlu0 %v2240_v23, %s2042_s10  ;;  %v433_v40 = vadd.f32 %v432_v39, %v365_v37  ;;  %v2310_v44 = vmax.f32 %v431_v42, 0.0  ;;  %v472_v39 = vld [vmem:[%s2888_s1] ss:$8 sm:$0x3] }
 0x113   : > { %v434_v43 = vpop.f32.mrf.mxu0 }
 0x114   : > { %v2292_v41 = vmax.f32 %v433_v40, 0.0  ;;  %v435_v45 = vadd.f32 %v434_v43, %v365_v37 }
 0x116   : > { %522 = vrot.lane.b32.xlu1 %v2244_v27, %s2042_s10  ;;  %445 = vrot.lane.b32.xlu0 %v2240_v23, %s2043_s12  ;;  %v2316_v46 = vmax.f32 %v435_v45, 0.0 }
 0x11a   : > { %447 = vrot.lane.b32.xlu1 %v2244_v27, %s2043_s12  ;;  %918 = vrot.lane.b32.xlu0 %v2240_v23, %s2044_s25 }
 0x11e   : > { %920 = vrot.lane.b32.xlu1 %v2244_v27, %s2044_s25  ;;  %676 = vrot.lane.b32.xlu0 %v2262_v30, %s2040_s24 }
 0x122   : > { %678 = vrot.lane.b32.xlu1 %v2268_v32, %s2040_s24  ;;  %602 = vrot.lane.b32.xlu0 %v2262_v30, %s2041_s26 }
 0x126   : > { %604 = vrot.lane.b32.xlu1 %v2268_v32, %s2041_s26  ;;  %528 = vrot.lane.b32.xlu0 %v2262_v30, %s2042_s10 }
 0x12a   : > { %530 = vrot.lane.b32.xlu1 %v2268_v32, %s2042_s10  ;;  %453 = vrot.lane.b32.xlu0 %v2262_v30, %s2043_s12 }
 0x12e   : > { %455 = vrot.lane.b32.xlu1 %v2268_v32, %s2043_s12  ;;  %926 = vrot.lane.b32.xlu0 %v2262_v30, %s2044_s25 }
 0x132   : > { %928 = vrot.lane.b32.xlu1 %v2268_v32, %s2044_s25  ;;  %672 = vrot.lane.b32.xlu0 %v2282_v38, %s2040_s24 }
 0x136   : > { %674 = vrot.lane.b32.xlu1 %v2292_v41, %s2040_s24  ;;  %598 = vrot.lane.b32.xlu0 %v2282_v38, %s2041_s26 }
 0x13a   : > { %600 = vrot.lane.b32.xlu1 %v2292_v41, %s2041_s26  ;;  %524 = vrot.lane.b32.xlu0 %v2282_v38, %s2042_s10 }
 0x13e   : > { %526 = vrot.lane.b32.xlu1 %v2292_v41, %s2042_s10  ;;  %449 = vrot.lane.b32.xlu0 %v2282_v38, %s2043_s12 }
 0x142   : > { %451 = vrot.lane.b32.xlu1 %v2292_v41, %s2043_s12  ;;  %922 = vrot.lane.b32.xlu0 %v2282_v38, %s2044_s25 }
 0x146   : > { %924 = vrot.lane.b32.xlu1 %v2292_v41, %s2044_s25  ;;  %680 = vrot.lane.b32.xlu0 %v2310_v44, %s2040_s24 }
 0x14a   : > { %682 = vrot.lane.b32.xlu1 %v2316_v46, %s2040_s24  ;;  %848 = vrot.lane.b32.xlu0 %v2282_v38, %s2045_s20  ;;  %s1590_s24 = scalar_lea.sflag [#allocation5], %s2195_s14 }
 0x14e   : > { %850 = vrot.lane.b32.xlu1 %v2292_v41, %s2045_s20  ;;  %606 = vrot.lane.b32.xlu0 %v2310_v44, %s2041_s26 }
 0x152   : > { %608 = vrot.lane.b32.xlu1 %v2316_v46, %s2041_s26  ;;  %532 = vrot.lane.b32.xlu0 %v2310_v44, %s2042_s10 }
 0x156   : > { %846 = vrot.lane.b32.xlu1 %v2244_v27, %s2045_s20  ;;  %457 = vrot.lane.b32.xlu0 %v2310_v44, %s2043_s12 }
 0x15a   : > { %534 = vrot.lane.b32.xlu1 %v2316_v46, %s2042_s10  ;;  %930 = vrot.lane.b32.xlu0 %v2310_v44, %s2044_s25 }
 0x15e   : > { %854 = vrot.lane.b32.xlu1 %v2268_v32, %s2045_s20  ;;  %856 = vrot.lane.b32.xlu0 %v2310_v44, %s2045_s20 }
 0x162   : > { %459 = vrot.lane.b32.xlu1 %v2316_v46, %s2043_s12  ;;  %844 = vrot.lane.b32.xlu0 %v2240_v23, %s2045_s20 }
 0x166   : > { %776 = vrot.lane.b32.xlu1 %v2292_v41, %s2046_s13  ;;  %852 = vrot.lane.b32.xlu0 %v2262_v30, %s2045_s20 }
 0x16a   : > { %932 = vrot.lane.b32.xlu1 %v2316_v46, %s2044_s25  ;;  %774 = vrot.lane.b32.xlu0 %v2282_v38, %s2046_s13 }
 0x16e   : > { %772 = vrot.lane.b32.xlu1 %v2244_v27, %s2046_s13  ;;  %782 = vrot.lane.b32.xlu0 %v2310_v44, %s2046_s13 }
 0x172   : > { %858 = vrot.lane.b32.xlu1 %v2316_v46, %s2045_s20  ;;  %770 = vrot.lane.b32.xlu0 %v2240_v23, %s2046_s13 }
 0x176   : > { %780 = vrot.lane.b32.xlu1 %v2268_v32, %s2046_s13  ;;  %778 = vrot.lane.b32.xlu0 %v2262_v30, %s2046_s13 }
 0x17a   : > { %784 = vrot.lane.b32.xlu1 %v2316_v46, %s2046_s13  ;;  %996 = vrot.lane.b32.xlu0 %v2282_v38, %s2047_s21  ;;  %s2820_s13 = scalar_lea.vmem [#allocation6], %s1683_s22 }
 0x17b   : > { %s1603_s22 = sshll.u32 %s2820_s13, 4  ;;  %s2834_s22 = int_to_ptr.vmem [resolvable:$true] %s1603_s22 }
 0x17c   : > { %v2353_v47 = vpop.permute.xlu0 %668  ;;  %s1969_s26 = scalar_lea.vmem %s2834_s22, 1024 }
 0x17d   : > { %p1970_p11 = scmp.ne.s32.totalorder %s2834_s22, %s1969_s26 }
 0x17e   : > { %998 = vrot.lane.b32.xlu1 %v2292_v41, %s2047_s21  ;;  %1004 = vrot.lane.b32.xlu0 %v2310_v44, %s2047_s21 }
 0x17f   : > { %p1971_p13 = pnand %p1970_p11, %p2930_p12 }
 0x180   : > { %v2357_v48 = vpop.permute.xlu1 %670  ;;  %v595_v49 = vpop.permute.xlu0 %594 }
 0x181   : > { %p1972_p4 = pneg %p1971_p13 }
 0x182   : > { %994 = vrot.lane.b32.xlu1 %v2244_v27, %s2047_s21  ;;  %992 = vrot.lane.b32.xlu0 %v2240_v23, %s2047_s21 }
 0x184   : > { %v597_v51 = vpop.permute.xlu1 %596  ;;  %v521_v52 = vpop.permute.xlu0 %520 }
 0x186   : > { %1006 = vrot.lane.b32.xlu1 %v2316_v46, %s2047_s21  ;;  %1000 = vrot.lane.b32.xlu0 %v2262_v30, %s2047_s21 }
 0x188   : > { %v2369_v55 = vpop.permute.xlu1 %522  ;;  %v2371_v56 = vpop.permute.xlu0 %445 }
 0x18a   : > { %1002 = vrot.lane.b32.xlu1 %v2268_v32, %s2047_s21  ;;  %1126 = vperm.xlu0 %1919, %v1112_v54   ;;  %v2499_v54 = vrot.slane %v472_v39, %v2418_v10  ;;  %s1822_s21 = sshll.u32 %s2117_s9, 8  ;;  %s2048_s9 = smov [#allocation6]  }
 0x18b   : > { %s2841_s16 = scalar_lea.hbm %s2895_s8, %s1822_s21  ;;  %s1973_s12 = sshll.u32 %s2048_s9, 4  ;;  %s1974_s12 = int_to_ptr.vmem [resolvable:$false] %s1973_s12 }
 0x18c   : > { %v2380_v60 = vpop.permute.xlu1 %447  ;;  %v2382_v61 = vpop.permute.xlu0 %918  ;;  %s1975_s25 = scalar_lea.vmem %s1974_s12, 2048  ;;  %p1976_p5 = scmp.lt.s32.totalorder %s2834_s22, %s1974_s12 }
 0x18d   : > { %p1977_p7 = scmp.lt.s32.totalorder %s1975_s25, %s1969_s26 }
 0x18e   : > { %1131 = vperm.xlu1 %1920, %v1113_v58   ;;  %1116 = vperm.xlu0 %1919, %v1110_v59  }
 0x18f   : > { %p1978_p8 = por %p1977_p7, %p1976_p5 }
 0x190   : > { %v2399_v4 = vpop.permute.xlu1 %920  ;;  %v2402_v5 = vpop.permute.xlu0 %676 }
 0x191   : > { %v689_v7 = vsel %vm684_vm1, %v2402_v5, %v2353_v47  ;;  %p1979_p10 = pnand %p1978_p8, %p1972_p4 }
 0x192   : > { %1121 = vperm.xlu1 %1920, %v1111_v2   ;;  %1478 = vperm.xlu0 %1919, %v1472_v3   ;;  %v2431_v15 = vmul.f32 %v2406_v6, %v689_v7 }
 0x194   : > { %v2420_v11 = vpop.permute.xlu1 %678  ;;  %v603_v12 = vpop.permute.xlu0 %602 }
 0x195   : > { %v690_v14 = vsel %vm684_vm1, %v2420_v11, %v2357_v48  ;;  %v611_v20 = vsel %vm610_vm2, %v595_v49, %v603_v12  ;;  %v615_v21 = vsel %vm610_vm2, %v603_v12, %v595_v49  ;;  %v686_v0 = vsel %vm684_vm1, %v2357_v48, %v2420_v11 }
 0x196   : > { %v2434_v16 = vmul.f32 %v2406_v6, %v690_v14  ;;  %1483 = vperm.xlu1 %1920, %v1473_v9   ;;  %1488 = vperm.xlu0 %1919, %v1474_v13   ;;  %v2466_v34 = vmul.f32 %v2437_v17, %v615_v21  ;;  %v2469_v35 = vmul.f32 %v2440_v18, %v611_v20 }
 0x197   : > { %v685_v12 = vsel %vm684_vm1, %v2353_v47, %v2402_v5 }
 0x198   : > { %v605_v24 = vpop.permute.xlu1 %604  ;;  %v529_v25 = vpop.permute.xlu0 %528 }
 0x199   : > { %v612_v28 = vsel %vm610_vm2, %v597_v51, %v605_v24  ;;  %v616_v29 = vsel %vm610_vm2, %v605_v24, %v597_v51  ;;  %v537_v40 = vsel %vm536_vm3, %v521_v52, %v529_v25  ;;  %v541_v42 = vsel %vm536_vm3, %v529_v25, %v521_v52 }
 0x19a   : > { %v2472_v36 = vmul.f32 %v2437_v17, %v616_v29  ;;  %v2475_v37 = vmul.f32 %v2440_v18, %v612_v28  ;;  %1493 = vperm.xlu1 %1920, %v1475_v22   ;;  %v2496_v52 = vrot.slane %v472_v39, %v2386_v63  ;;  %v2502_v57 = vmul.f32 %v2460_v31, %v541_v42 }
 0x19b   : > { %v2505_v58 = vmul.f32 %v2463_v33, %v537_v40 }
 0x19c   : > { %v531_v43 = vpop.permute.xlu1 %530  ;;  %v454_v45 = vpop.permute.xlu0 %453 }
 0x19d   : > { %v538_v51 = vsel %vm536_vm3, %v2369_v55, %v531_v43  ;;  %v542_v53 = vsel %vm536_vm3, %v531_v43, %v2369_v55  ;;  %v1722_v55 = vld [vmem:[%s2888_s1 + $0x6] ss:$8 sm:$0x3]  ;;  %v464_v3 = vsel %vm463_vm4, %v2371_v56, %v454_v45  ;;  %v468_v7 = vsel %vm463_vm4, %v454_v45, %v2371_v56 }
 0x19e   : > { %v2508_v59 = vmul.f32 %v2460_v31, %v542_v53  ;;  %v2511_v2 = vmul.f32 %v2463_v33, %v538_v51  ;;  %v2534_v56 = vrot.slane %v1722_v55, %v2386_v63  ;;  %v2537_v20 = vrot.slane %v1722_v55, %v2418_v10 }
 0x19f   : > { %v2540_v21 = vmul.f32 %v2496_v52, %v468_v7  ;;  %v2543_v22 = vmul.f32 %v2499_v54, %v464_v3 }
 0x1a0   : > { %v456_v8 = vpop.permute.xlu1 %455  ;;  %v927_v9 = vpop.permute.xlu0 %926 }
 0x1a1   : > { %v465_v14 = vsel %vm463_vm4, %v2380_v60, %v456_v8  ;;  %v469_v19 = vsel %vm463_vm4, %v456_v8, %v2380_v60  ;;  %v935_v60 = vsel %vm934_vm5, %v2382_v61, %v927_v9  ;;  %v939_v28 = vsel %vm934_vm5, %v927_v9, %v2382_v61 }
 0x1a2   : > { %v2546_v24 = vmul.f32 %v2496_v52, %v469_v19  ;;  %v2549_v25 = vmul.f32 %v2499_v54, %v465_v14  ;;  %v2568_v51 = vmul.f32 %v2534_v56, %v935_v60  ;;  %v2571_v61 = vmul.f32 %v2537_v20, %v939_v28 }
 0x1a4   : > { %v929_v29 = vpop.permute.xlu1 %928  ;;  %v673_v39 = vpop.permute.xlu0 %672 }
 0x1a5   : > { %v936_v43 = vsel %vm934_vm5, %v2399_v4, %v929_v29  ;;  %v940_v45 = vsel %vm934_vm5, %v929_v29, %v2399_v4  ;;  %v703_v4 = vrot.slane %v2391_v1, %v2418_v10 }
 0x1a6   : > { %v2574_v53 = vmul.f32 %v2534_v56, %v936_v43  ;;  %v2577_v55 = vmul.f32 %v2537_v20, %v940_v45 }
 0x1a7   : > { %v709_v50 = vmul.f32 %v703_v4, %v686_v0  ;;  %v707_v26 = vmul.f32 %v703_v4, %v685_v12 }
 0x1a8   : > { %v675_v3 = vpop.permute.xlu1 %674  ;;  %v599_v7 = vpop.permute.xlu0 %598 }
 0x1a9   : > { %v1836_v0 = vpack.c.bf16 %v709_v50, %v707_v26 }
 0x1ac   : > { %v601_v9 = vpop.permute.xlu1 %600  ;;  %v525_v14 = vpop.permute.xlu0 %524 }
 0x1b0   : > { %v527_v19 = vpop.permute.xlu1 %526  ;;  %v2583_v60 = vpop.permute.xlu0 %449 }
 0x1b4   : > { %v2585_v28 = vpop.permute.xlu1 %451  ;;  %v2587_v29 = vpop.permute.xlu0 %922 }
 0x1b8   : > { %v2589_v43 = vpop.permute.xlu1 %924  ;;  %v681_v45 = vpop.permute.xlu0 %680 }
 0x1b9   : > { %v687_v8 = vsel %vm684_vm1, %v673_v39, %v681_v45  ;;  %v691_v42 = vsel %vm684_vm1, %v681_v45, %v673_v39 }
 0x1ba   : > { %v710_v11 = vmul.f32 %v2406_v6, %v691_v42  ;;  %v711_v39 = vmul.f32 %v703_v4, %v687_v8 }
 0x1bc   : > { %v683_v40 = vpop.permute.xlu1 %682  ;;  %v2601_v13 = vpop.permute.xlu0 %848 }
 0x1bd   : > { %v688_v48 = vsel %vm684_vm1, %v675_v3, %v683_v40  ;;  %v692_v1 = vsel %vm684_vm1, %v683_v40, %v675_v3 }
 0x1be   : > { %v712_v49 = vmul.f32 %v2406_v6, %v692_v1  ;;  %v713_v45 = vmul.f32 %v703_v4, %v688_v48 }
 0x1c0   : > { %v2613_v27 = vpop.permute.xlu1 %850  ;;  %v607_v23 = vpop.permute.xlu0 %606  ;;  %v1838_v32 = vpack.c.bf16 %v713_v45, %v711_v39  ;;  %v1837_v30 = vpack.c.bf16 %v712_v49, %v710_v11  ;;  %v2918_v45 = vpack.c.bf16 %v2472_v36, %v2466_v34  ;;  %v2919_v34 = vpack.c.bf16 %v2511_v2, %v2505_v58 }
 0x1c1   : > { %v613_v47 = vsel %vm610_vm2, %v599_v7, %v607_v23  ;;  %v617_v5 = vsel %vm610_vm2, %v607_v23, %v599_v7  ;;  %v2916_v23 = vpack.c.bf16 %v2434_v16, %v2431_v15  ;;  %v2920_v58 = vpack.c.bf16 %v2508_v59, %v2502_v57 }
 0x1c2   : > { %1350 = vmatprep.subr.bf16.mxu1 %v1838_v32  ;;  %v636_v49 = vmul.f32 %v2437_v17, %v617_v5  ;;  %v637_v32 = vmul.f32 %v2440_v18, %v613_v47  ;;  %v2921_v57 = vpack.c.bf16 %v2549_v25, %v2543_v22 }
 0x1c3   : > { %1351 = vmatpush1.bf16.msra.mxu1 %v1837_v30 }
 0x1c4   : > { %v609_v40 = vpop.permute.xlu1 %608  ;;  %1352 = vmatprep.subr.bf16.mxu1 %v1836_v0  ;;  %v533_v6 = vpop.permute.xlu0 %532 }
 0x1c5   : > { %v614_v12 = vsel %vm610_vm2, %v601_v9, %v609_v40  ;;  %v618_v42 = vsel %vm610_vm2, %v609_v40, %v601_v9  ;;  %v539_v4 = vsel %vm536_vm3, %v525_v14, %v533_v6  ;;  %v543_v9 = vsel %vm536_vm3, %v533_v6, %v525_v14 }
 0x1c6   : > { %v638_v26 = vmul.f32 %v2437_v17, %v618_v42  ;;  %v639_v50 = vmul.f32 %v2440_v18, %v614_v12  ;;  %v2917_v18 = vpack.c.bf16 %v2475_v37, %v2469_v35  ;;  %v562_v1 = vmul.f32 %v2460_v31, %v543_v9 }
 0x1c7   : > { %1353 = vmatpush1.bf16.msra.mxu1 %v2916_v23  ;;  %v563_v11 = vmul.f32 %v2463_v33, %v539_v4 }
 0x1c8   : > { %v2630_v30 = vpop.permute.xlu1 %846  ;;  %v458_v3 = vpop.permute.xlu0 %457  ;;  %v1834_v7 = vpack.c.bf16 %v639_v50, %v637_v32  ;;  %v1833_v8 = vpack.c.bf16 %v638_v26, %v636_v49 }
 0x1ca   : > { %1354 = vmatprep.subr.bf16.mxu1 %v1834_v7 }
 0x1cb   : > { %1355 = vmatpush1.bf16.msra.mxu1 %v1833_v8  ;;  %v2922_v8 = vpack.c.bf16 %v2546_v24, %v2540_v21 }
 0x1cc   : > { %v535_v17 = vpop.permute.xlu1 %534  ;;  %1356 = vmatprep.subr.bf16.mxu1 %v2917_v18  ;;  %v931_v15 = vpop.permute.xlu0 %930 }
 0x1cd   : > { %v540_v16 = vsel %vm536_vm3, %v527_v19, %v535_v17  ;;  %v544_v48 = vsel %vm536_vm3, %v535_v17, %v527_v19  ;;  %v466_v19 = vsel %vm463_vm4, %v2583_v60, %v458_v3 }
 0x1ce   : > { %v564_v39 = vmul.f32 %v2460_v31, %v544_v48  ;;  %v565_v14 = vmul.f32 %v2463_v33, %v540_v16  ;;  %v470_v31 = vsel %vm463_vm4, %v458_v3, %v2583_v60  ;;  %v489_v12 = vmul.f32 %v2499_v54, %v466_v19  ;;  %v1712_v16 = vld [vmem:[%s2888_s1 + $0x4] ss:$8 sm:$0x3] }
 0x1cf   : > { %1357 = vmatpush1.bf16.msra.mxu1 %v2918_v45  ;;  %v488_v6 = vmul.f32 %v2496_v52, %v470_v31  ;;  %v805_v31 = vrot.slane %v1712_v16, %v2418_v10 }
 0x1d0   : > { %v2650_v35 = vpop.permute.xlu1 %854  ;;  %v857_v37 = vpop.permute.xlu0 %856  ;;  %v1830_v0 = vpack.c.bf16 %v565_v14, %v563_v11  ;;  %v1829_v47 = vpack.c.bf16 %v564_v39, %v562_v1  ;;  %v2923_v1 = vpack.c.bf16 %v2577_v55, %v2571_v61  ;;  %v801_v55 = vrot.slane %v1712_v16, %v2386_v63 }
 0x1d1   : > { %v866_v24 = vsel %vm860_vm6, %v2650_v35, %v2630_v30  ;;  %v862_v61 = vsel %vm860_vm6, %v2630_v30, %v2650_v35 }
 0x1d2   : > { %1358 = vmatprep.subr.bf16.mxu1 %v1830_v0 }
 0x1d3   : > { %1359 = vmatpush1.bf16.msra.mxu1 %v1829_v47 }
 0x1d4   : > { %v460_v33 = vpop.permute.xlu1 %459  ;;  %1360 = vmatprep.subr.bf16.mxu1 %v2919_v34  ;;  %v845_v36 = vpop.permute.xlu0 %844 }
 0x1d5   : > { %v467_v5 = vsel %vm463_vm4, %v2585_v28, %v460_v33  ;;  %v471_v40 = vsel %vm463_vm4, %v460_v33, %v2585_v28  ;;  %v937_v28 = vsel %vm934_vm5, %v2587_v29, %v931_v15  ;;  %v2924_v33 = vpack.c.bf16 %v2574_v53, %v2568_v51 }
 0x1d6   : > { %v490_v60 = vmul.f32 %v2496_v52, %v471_v40  ;;  %v491_v42 = vmul.f32 %v2499_v54, %v467_v5  ;;  %v941_v52 = vsel %vm934_vm5, %v931_v15, %v2587_v29  ;;  %v960_v3 = vmul.f32 %v2534_v56, %v937_v28  ;;  %v1717_v29 = vld [vmem:[%s2888_s1 + $0x5] ss:$8 sm:$0x3] }
 0x1d7   : > { %1361 = vmatpush1.bf16.msra.mxu1 %v2920_v58  ;;  %v961_v7 = vmul.f32 %v2537_v20, %v941_v52  ;;  %v875_v18 = vrot.slane %v1717_v29, %v2386_v63  ;;  %v879_v15 = vrot.slane %v1717_v29, %v2418_v10 }
 0x1d8   : > { %v2674_v2 = vpop.permute.xlu1 %776  ;;  %v853_v49 = vpop.permute.xlu0 %852  ;;  %v1826_v32 = vpack.c.bf16 %v491_v42, %v489_v12  ;;  %v1825_v26 = vpack.c.bf16 %v490_v60, %v488_v6 }
 0x1d9   : > { %v865_v21 = vsel %vm860_vm6, %v853_v49, %v845_v36  ;;  %v861_v39 = vsel %vm860_vm6, %v845_v36, %v853_v49  ;;  %v885_v34 = vmul.f32 %v879_v15, %v866_v24  ;;  %v884_v35 = vmul.f32 %v875_v18, %v862_v61 }
 0x1da   : > { %1362 = vmatprep.subr.bf16.mxu1 %v1826_v32  ;;  %v883_v0 = vmul.f32 %v879_v15, %v865_v21  ;;  %v882_v36 = vmul.f32 %v875_v18, %v861_v39 }
 0x1db   : > { %1363 = vmatpush1.bf16.msra.mxu1 %v1825_v26 }
 0x1dc   : > { %v933_v54 = vpop.permute.xlu1 %932  ;;  %1364 = vmatprep.subr.bf16.mxu1 %v2921_v57  ;;  %v775_v59 = vpop.permute.xlu0 %774  ;;  %v1848_v60 = vpack.c.bf16 %v885_v34, %v883_v0  ;;  %v1847_v26 = vpack.c.bf16 %v884_v35, %v882_v36  ;;  %v1929_v35 = vld [vmem:[%s2891_s4 + $0x18] ss:$12 sps:$4 sm:$0xff]  }
 0x1dd   : > { %v938_v50 = vsel %vm934_vm5, %v2589_v43, %v933_v54  ;;  %v942_v23 = vsel %vm934_vm5, %v933_v54, %v2589_v43 }
 0x1de   : > { %v962_v22 = vmul.f32 %v2534_v56, %v938_v50  ;;  %v963_v25 = vmul.f32 %v2537_v20, %v942_v23  ;;  %v863_v56 = vsel %vm860_vm6, %v2601_v13, %v857_v37  ;;  %v867_v20 = vsel %vm860_vm6, %v857_v37, %v2601_v13 }
 0x1df   : > { %1365 = vmatpush1.bf16.msra.mxu1 %v2922_v8  ;;  %v886_v11 = vmul.f32 %v875_v18, %v863_v56  ;;  %v887_v37 = vmul.f32 %v879_v15, %v867_v20  ;;  %v1842_v20 = vpack.c.bf16 %v2316_v46, %v2310_v44  ;;  %v2925_v44 = vld [vmem:[#allocation12_spill] sm:$0xff]  ;;  %v2926_v46 = vld [vmem:[#allocation13_spill] sm:$0xff] }
 0x1e0   : > { %v773_v4 = vpop.permute.xlu1 %772  ;;  %v783_v43 = vpop.permute.xlu0 %782  ;;  %v1854_v9 = vpack.c.bf16 %v963_v25, %v961_v7  ;;  %v1853_v17 = vpack.c.bf16 %v962_v22, %v960_v3 }
 0x1e1   : > { %v789_v12 = vsel %vm786_vm7, %v775_v59, %v783_v43  ;;  %v793_v30 = vsel %vm786_vm7, %v783_v43, %v775_v59 }
 0x1e2   : > { %1366 = vmatprep.subr.bf16.mxu1 %v1854_v9  ;;  %v812_v53 = vmul.f32 %v801_v55, %v789_v12  ;;  %v813_v58 = vmul.f32 %v805_v31, %v793_v30  ;;  %v1727_v9 = vld [vmem:[%s2888_s1 + $0x7] ss:$8 sm:$0x3]  ;;  %v1926_v30 = vld [vmem:[%s2891_s4 + $0x8] ss:$12 sps:$4 sm:$0xff]  }
 0x1e3   : > { %1367 = vmatpush2.bf16.msra.mxu1 %v1853_v17  ;;  %v1027_v56 = vrot.slane %v1727_v9, %v2418_v10  ;;  %v1841_v10 = vpack.c.bf16 %v2292_v41, %v2282_v38 }
 0x1e4   : > { %v859_v48 = vpop.permute.xlu1 %858  ;;  %1368 = vmatprep.subr.bf16.mxu1 %v2923_v1  ;;  %v771_v13 = vpop.permute.xlu0 %770 }
 0x1e5   : > { %v864_v14 = vsel %vm860_vm6, %v2613_v27, %v859_v48  ;;  %v868_v45 = vsel %vm860_vm6, %v859_v48, %v2613_v27 }
 0x1e6   : > { %v888_v47 = vmul.f32 %v875_v18, %v864_v14  ;;  %v889_v19 = vmul.f32 %v879_v15, %v868_v45  ;;  %v1023_v15 = vrot.slane %v1727_v9, %v2386_v63 }
 0x1e7   : > { %1369 = vmatpush2.bf16.msra.mxu1 %v2924_v33 }
 0x1e8   : > { %v781_v27 = vpop.permute.xlu1 %780  ;;  %v779_v5 = vpop.permute.xlu0 %778  ;;  %v1850_v40 = vpack.c.bf16 %v889_v19, %v887_v37  ;;  %v1849_v6 = vpack.c.bf16 %v888_v47, %v886_v11 }
 0x1e9   : > { %v792_v42 = vsel %vm786_vm7, %v781_v27, %v773_v4  ;;  %v791_v51 = vsel %vm786_vm7, %v779_v5, %v771_v13  ;;  %v788_v28 = vsel %vm786_vm7, %v773_v4, %v781_v27  ;;  %v787_v52 = vsel %vm786_vm7, %v771_v13, %v779_v5 }
 0x1ea   : > { %1370 = vmatprep.subr.bf16.mxu1 %v1850_v40  ;;  %v811_v59 = vmul.f32 %v805_v31, %v792_v42  ;;  %v809_v50 = vmul.f32 %v805_v31, %v791_v51  ;;  %v810_v8 = vmul.f32 %v801_v55, %v788_v28  ;;  %v808_v4 = vmul.f32 %v801_v55, %v787_v52  ;;  %v1923_v40 = vld [vmem:[%s2891_s4] ss:$12 sps:$4 sm:$0xff]  }
 0x1eb   : > { %1371 = vmatpush2.bf16.msra.mxu1 %v1849_v6  ;;  %v1840_v13 = vpack.c.bf16 %v2926_v46, %v2925_v44  ;;  %v1927_v6 = vld [vmem:[%s2891_s4 + $0x1c] ss:$12 sps:$4 sm:$0xff]   ;;  %v1930_v42 = vld [vmem:[%s2891_s4 + $0x20] ss:$12 sps:$4 sm:$0xff]  }
 0x1ec   : > { %v785_v49 = vpop.permute.xlu1 %784  ;;  %1372 = vmatprep.subr.bf16.mxu1 %v1848_v60  ;;  %v997_v32 = vpop.permute.xlu0 %996  ;;  %v1844_v43 = vpack.c.bf16 %v811_v59, %v809_v50  ;;  %v1843_v18 = vpack.c.bf16 %v810_v8, %v808_v4  ;;  %v2929_v60 = vmov 0  }
 0x1ed   : > { %v790_v54 = vsel %vm786_vm7, %v2674_v2, %v785_v49  ;;  %v794_v57 = vsel %vm786_vm7, %v785_v49, %v2674_v2 }
 0x1ee   : > { %v814_v23 = vmul.f32 %v801_v55, %v790_v54  ;;  %v815_v3 = vmul.f32 %v805_v31, %v794_v57  ;;  %v2927_v55 = vld [vmem:[#allocation10_spill] sm:$0xff]  ;;  %v2928_v31 = vld [vmem:[#allocation11_spill] sm:$0xff] }
 0x1ef   : > { %1373 = vmatpush2.bf16.msra.mxu1 %v1847_v26  ;;  %v1839_v33 = vpack.c.bf16 %v2928_v31, %v2927_v55  ;;  %v1932_v55 = vld [vmem:[%s2893_s6 + $0x8] sm:$0xff]  }
 0x1f0   : > { %v999_v7 = vpop.permute.xlu1 %998  ;;  %v1005_v29 = vpop.permute.xlu0 %1004  ;;  %v1846_v22 = vpack.c.bf16 %v815_v3, %v813_v58  ;;  %v1845_v25 = vpack.c.bf16 %v814_v23, %v812_v53 }
 0x1f1   : > { %v1011_v21 = vsel %vm1008_vm8, %v997_v32, %v1005_v29  ;;  %v1015_v24 = vsel %vm1008_vm8, %v1005_v29, %v997_v32 }
 0x1f2   : > { %1374 = vmatprep.subr.bf16.mxu1 %v1846_v22  ;;  %v1034_v11 = vmul.f32 %v1023_v15, %v1011_v21  ;;  %v1035_v39 = vmul.f32 %v1027_v56, %v1015_v24 }
 0x1f3   : > { %1375 = vmatpush2.bf16.msra.mxu1 %v1845_v25 }
 0x1f4   : > { %v995_v2 = vpop.permute.xlu1 %994  ;;  %1376 = vmatprep.subr.bf16.mxu1 %v1844_v43  ;;  %v993_v17 = vpop.permute.xlu0 %992 }
 0x1f7   : > { %1377 = vmatpush2.bf16.msra.mxu1 %v1843_v18 }
 0x1f8   : > { %v1007_v16 = vpop.permute.xlu1 %1006  ;;  %1378 = vmatprep.subr.bf16.mxu1 %v1842_v20  ;;  %v1001_v48 = vpop.permute.xlu0 %1000 }
 0x1f9   : > { %v1012_v1 = vsel %vm1008_vm8, %v999_v7, %v1007_v16  ;;  %v1016_v63 = vsel %vm1008_vm8, %v1007_v16, %v999_v7  ;;  %v1009_v37 = vsel %vm1008_vm8, %v993_v17, %v1001_v48  ;;  %v1013_v0 = vsel %vm1008_vm8, %v1001_v48, %v993_v17 }
 0x1fa   : > { %v1036_v14 = vmul.f32 %v1023_v15, %v1012_v1  ;;  %v1037_v45 = vmul.f32 %v1027_v56, %v1016_v63  ;;  %v1030_v34 = vmul.f32 %v1023_v15, %v1009_v37  ;;  %v1031_v36 = vmul.f32 %v1027_v56, %v1013_v0 }
 0x1fb   : > { %1379 = vmatpush2.bf16.msra.mxu1 %v1841_v10 }
 0x1fc   : > { %v1857_v47 = vpack.c.bf16 %v1036_v14, %v1034_v11  ;;  %v1003_v19 = vpop.permute.xlu1 %1002  ;;  %1380 = vmatprep.subr.bf16.mxu1 %v1840_v13  ;;  %v1858_v61 = vpack.c.bf16 %v1037_v45, %v1035_v39 }
 0x1fd   : > { %v1010_v38 = vsel %vm1008_vm8, %v995_v2, %v1003_v19  ;;  %v1014_v41 = vsel %vm1008_vm8, %v1003_v19, %v995_v2 }
 0x1fe   : > { %v1032_v27 = vmul.f32 %v1023_v15, %v1010_v38  ;;  %v1033_v5 = vmul.f32 %v1027_v56, %v1014_v41  ;;  %1415 = vmatprep.subr.bf16.mxu0 %v1858_v61  ;;  %v1931_v41 = vld [vmem:[%s2893_s6] sm:$0xff]  }
 0x1ff   : > { %1381 = vmatpush2.bf16.msra.mxu1 %v1839_v33  ;;  %1416 = vmatpush1.bf16.msra.mxu0 %v1857_v47 }
 0x200   : > { %v1855_v62 = vpack.c.bf16 %v1032_v27, %v1030_v34  ;;  %v1856_v12 = vpack.c.bf16 %v1033_v5, %v1031_v36  ;;  %v1933_v27 = vld [vmem:[%s2201_s19] sm:$0xff] }
 0x202   : > { %1383 = vmatmul.mubr.bf16.vlgmr.msra.gmra.mxu1 %v1923_v40  ;;  %1417 = vmatprep.subr.bf16.mxu0 %v1856_v12 }
 0x203   : > { %1418 = vmatpush1.bf16.msra.mxu0 %v1855_v62  ;;  %1392 = vmatprep.mubr.bf16.mxu1 %v1927_v6 }
 0x205   : > { %v1127_v57 = vpop.permute.xlu0 %1126 }
 0x206   : > { %1774 = vmatmul.mubr.msk.bf16.vlgmr.msra.gmra.mxu0 %vm377_vm0, %v1926_v30  ;;  %v1934_v30 = vld [vmem:[%s2201_s19 + $0x8] sm:$0xff] }
 0x207   : > { %1445 = vmatprep.mubr.bf16.mxu0 %v2929_v60 }
 0x209   : > { %v1132_v28 = vpop.permute.xlu1 %1131  ;;  %v1117_v25 = vpop.permute.xlu0 %1116 }
 0x20a   : > { %1393 = vmatmul.mubr.bf16.gmra.mxu1 %v1929_v35 }
 0x20d   : > { %v1122_v7 = vpop.permute.xlu1 %1121  ;;  %v1479_v31 = vpop.permute.xlu0 %1478 }
 0x20e   : > { %1775 = vmatmul.mubr.msk.bf16.gmra.mxu0 %vm377_vm0, %v1930_v42 }
 0x20f   : > { %1544 = vmatprep.mubr.bf16.mxu0 %v2929_v60 }
 0x211   : > { %v1484_v6 = vpop.permute.xlu1 %1483 }
 0x2c2   : > { %v1384_v51 = vpop.f32.mrf.mxu1 }
 0x2c3   : > { %v1385_v63 = vadd.f32 %v1384_v51, %v1117_v25 }
 0x2c4   : > { %v1386_v53 = vpop.f32.mrf.mxu1 }
 0x2c5   : > { %v1387_v9 = vadd.f32 %v1386_v53, %v1117_v25  ;;  %v1935_v53 = vld [vmem:[%s2201_s19 + $0x10] sm:$0xff] }
 0x2c6   : > { %v1388_v58 = vpop.f32.mrf.mxu1  ;;  %v1437_v49 = vpop.f32.mrf.mxu0 }
 0x2c7   : > { %v1389_v21 = vadd.f32 %v1388_v58, %v1122_v7  ;;  %v1438_v39 = vadd.f32 %v1437_v49, %v1385_v63 }
 0x2c8   : > { %v1390_v32 = vpop.f32.mrf.mxu1  ;;  %v1439_v26 = vpop.f32.mrf.mxu0 }
 0x2c9   : > { %v1391_v8 = vadd.f32 %v1390_v32, %v1122_v7  ;;  %v1440_v48 = vadd.f32 %v1439_v26, %v1387_v9  ;;  %v1456_v61 = vmax.f32 %v1438_v39, 0.0  ;;  %v1489_v32 = vpop.permute.xlu0 %1488 }
 0x2ca   : > { %v1394_v52 = vpop.f32.mrf.mxu1  ;;  %v1441_v54 = vpop.f32.mrf.mxu0 }
 0x2cb   : > { %v1395_v2 = vadd.f32 %v1394_v52, %v1127_v57  ;;  %v1442_v10 = vadd.f32 %v1441_v54, %v1389_v21  ;;  %v1457_v45 = vmax.f32 %v1440_v48, 0.0  ;;  %v1936_v52 = vld [vmem:[%s2201_s19 + $0x18] sm:$0xff] }
 0x2cc   : > { %v1396_v59 = vpop.f32.mrf.mxu1  ;;  %v1443_v50 = vpop.f32.mrf.mxu0 }
 0x2cd   : > { %v1397_v4 = vadd.f32 %v1396_v59, %v1127_v57  ;;  %v1444_v18 = vadd.f32 %v1443_v50, %v1391_v8  ;;  %v1458_v0 = vmax.f32 %v1442_v10, 0.0  ;;  %v1938_v8 = vld [vmem:[%s2201_s19 + $0x28] sm:$0xff] }
 0x2ce   : > { %v1398_v23 = vpop.f32.mrf.mxu1  ;;  %v1447_v3 = vpop.f32.mrf.mxu0 }
 0x2cf   : > { %v1399_v43 = vadd.f32 %v1398_v23, %v1132_v28  ;;  %v1448_v24 = vadd.f32 %v1447_v3, %v1395_v2  ;;  %v1459_v46 = vmax.f32 %v1444_v18, 0.0  ;;  %v1468_v38 = vpack.c.bf16 %v1458_v0, %v1456_v61  ;;  %v1937_v23 = vld [vmem:[%s2201_s19 + $0x20] sm:$0xff] }
 0x2d0   : > { %v1400_v29 = vpop.f32.mrf.mxu1  ;;  %v1449_v22 = vpop.f32.mrf.mxu0 }
 0x2d1   : > { %v1401_v15 = vadd.f32 %v1400_v29, %v1132_v28  ;;  %v1450_v56 = vadd.f32 %v1449_v22, %v1397_v4  ;;  %v1460_v14 = vmax.f32 %v1448_v24, 0.0  ;;  %v1469_v19 = vpack.c.bf16 %v1459_v46, %v1457_v45  ;;  %v1494_v29 = vpop.permute.xlu1 %1493 }
 0x2d2   : > { %v1451_v17 = vpop.f32.mrf.mxu0 }
 0x2d3   : > { %v1452_v20 = vadd.f32 %v1451_v17, %v1399_v43  ;;  %v1461_v13 = vmax.f32 %v1450_v56, 0.0  ;;  %v1939_v17 = vld [vmem:[%s2201_s19 + $0x30] sm:$0xff] }
 0x2d4   : > { %v1453_v16 = vpop.f32.mrf.mxu0 }
 0x2d5   : > { %v1454_v1 = vadd.f32 %v1453_v16, %v1401_v15  ;;  %v1462_v44 = vmax.f32 %v1452_v20, 0.0  ;;  %v1940_v20 = vld [vmem:[%s2201_s19 + $0x38] sm:$0xff] }
 0x2d7   : > { %v1463_v11 = vmax.f32 %v1454_v1, 0.0  ;;  %v1470_v47 = vpack.c.bf16 %v1462_v44, %v1460_v14 }
 0x2d9   : > { %v1471_v37 = vpack.c.bf16 %v1463_v11, %v1461_v13 }
 0x2db   : > { %1524 = vmatprep.subr.bf16.mxu0 %v1471_v37 }
 0x2dc   : > { %1525 = vmatpush1.bf16.msra.mxu0 %v1470_v47 }
 0x2dd   : > { %1526 = vmatprep.subr.bf16.mxu0 %v1469_v19 }
 0x2e0   : > { %1527 = vmatpush1.bf16.msra.mxu0 %v1468_v38 }
 0x2e3   : > { %1778 = vmatmul.mubr.msk.bf16.vlgmr.msra.gmra.mxu0 %vm377_vm0, %v1931_v41 }
 0x2e4   : > { %1554 = vmatprep.mubr.bf16.mxu0 %v2929_v60 }
 0x2eb   : > { %1779 = vmatmul.mubr.msk.bf16.gmra.mxu0 %vm377_vm0, %v1932_v55 }
 0x3a3   : > { %v1546_v33 = vpop.f32.mrf.mxu0 }
 0x3a4   : > { %v1547_v34 = vadd.f32 %v1546_v33, %v1479_v31 }
 0x3a5   : > { %v1548_v36 = vpop.f32.mrf.mxu0 }
 0x3a6   : > { %v1565_v5 = vadd.f32 %v1933_v27, %v1547_v34  ;;  %v1549_v40 = vadd.f32 %v1548_v36, %v1479_v31 }
 0x3a7   : > { %v1550_v62 = vpop.f32.mrf.mxu0 }
 0x3a8   : > { %v1573_v12 = vmax.f32 %v1565_v5, 0.0  ;;  %v1566_v35 = vadd.f32 %v1934_v30, %v1549_v40  ;;  %v1551_v60 = vadd.f32 %v1550_v62, %v1484_v6 }
 0x3a9   : > { %v1552_v42 = vpop.f32.mrf.mxu0 }
 0x3aa   : > { %1581 = vst [vmem:[%s2820_s13] sm:$0xff] %v1573_v12  ;;  %v1574_v51 = vmax.f32 %v1566_v35, 0.0  ;;  %v1567_v58 = vadd.f32 %v1935_v53, %v1551_v60  ;;  %v1553_v49 = vadd.f32 %v1552_v42, %v1484_v6 }
 0x3ab   : > { %v1556_v26 = vpop.f32.mrf.mxu0 }
 0x3ac   : > { %1582 = vst [vmem:[%s2820_s13 + $0x8] sm:$0xff] %v1574_v51  ;;  %v1575_v28 = vmax.f32 %v1567_v58, 0.0  ;;  %v1568_v54 = vadd.f32 %v1936_v52, %v1553_v49  ;;  %v1557_v57 = vadd.f32 %v1556_v26, %v1489_v32 }
 0x3ad   : > { %v1558_v59 = vpop.f32.mrf.mxu0 }
 0x3ae   : > { %1583 = vst [vmem:[%s2820_s13 + $0x10] sm:$0xff] %v1575_v28  ;;  %v1576_v50 = vmax.f32 %v1568_v54, 0.0  ;;  %v1569_v3 = vadd.f32 %v1937_v23, %v1557_v57  ;;  %v1559_v7 = vadd.f32 %v1558_v59, %v1489_v32 }
 0x3af   : > { %v1560_v22 = vpop.f32.mrf.mxu0 }
 0x3b0   : > { %1584 = vst [vmem:[%s2820_s13 + $0x18] sm:$0xff] %v1576_v50  ;;  %v1577_v25 = vmax.f32 %v1569_v3, 0.0  ;;  %v1570_v4 = vadd.f32 %v1938_v8, %v1559_v7  ;;  %v1561_v43 = vadd.f32 %v1560_v22, %v1494_v29 }
 0x3b1   : > { %v1562_v9 = vpop.f32.mrf.mxu0 }
 0x3b2   : > { %1585 = vst [vmem:[%s2820_s13 + $0x20] sm:$0xff] %v1577_v25  ;;  %v1578_v2 = vmax.f32 %v1570_v4, 0.0  ;;  %v1571_v18 = vadd.f32 %v1939_v17, %v1561_v43  ;;  %v1563_v15 = vadd.f32 %v1562_v9, %v1494_v29 }
 0x3b4   : > { %1586 = vst [vmem:[%s2820_s13 + $0x28] sm:$0xff] %v1578_v2  ;;  %v1579_v56 = vmax.f32 %v1571_v18, 0.0  ;;  %v1572_v21 = vadd.f32 %v1940_v20, %v1563_v15 }
 0x3b6   : > { %1587 = vst [vmem:[%s2820_s13 + $0x30] sm:$0xff] %v1579_v56  ;;  %v1580_v24 = vmax.f32 %v1572_v21, 0.0 }
 0x3b8   : > { %1588 = vst [vmem:[%s2820_s13 + $0x38] sm:$0xff] %v1580_v24 }
 0x3b9   : > { %1982 = shalt.err (!%p1979_p10)
}
 0x3ba   : > { %s1983_s19 = scalar_lea.hbm %s2841_s16, 1024  ;;  %s1987_s21 = scalar_lea.hbm %s2895_s8, 2048 }
 0x3bb   : > { %p1984_p1 = scmp.ne.s32.totalorder %s2841_s16, %s1983_s19  ;;  %p1988_p0 = scmp.lt.s32.totalorder %s2841_s16, %s2895_s8 }
 0x3bc   : > { %p1989_p2 = scmp.lt.s32.totalorder %s1987_s21, %s1983_s19 }
 0x3bd   : > { %p1985_p3 = pnand %p1984_p1, %p2930_p12 }
 0x3be   : > { %p1990_p6 = por %p1989_p2, %p1988_p0 }
 0x3bf   : > { %p1986_p9 = pneg %p1985_p3 }
 0x3c1   : > { %p1991_p11 = pnand %p1990_p6, %p1986_p9 }
 0x3c3   : > { %1994 = shalt.err (!%p1991_p11)
}
 0x3c4   : > { %s2049_s26 = smov 256   ;;  %s2050_s9 = smov 512  }
 0x3c5   : > { %1861 = dma.vmem_to_hbm [thread:$0]  (%p2930_p12), %s2834_s22, 1024, %s2841_s16, %s1590_s24, %s2049_s26, %s2050_s9, %s2042_s10  }
 0x3c6 PF: > { %s1618_s12 = sand.u32 1, %s2021_s27   ;;  %p2931_p13 = scmp.ne.s32.totalorder %s2908_s18, 0 }
 0x3c7   : > { %p2932_p4 = scmp.ge.s32.totalorder %s2033_s30, 2  ;;  %s1619_s25 = scalar_lea.sflag [#allocation5], %s1618_s12 }
 0x3c9   : > { %p1868_p5 = pnand %p2932_p4, %p2931_p13 }
 0x3cb   : > { %p1869_p7 = pneg %p1868_p5 }
 0x3cd   : > { %2016 = dma.done.wait (%p1869_p7), %s1619_s25, 1024  }
 0x3ce   : > { %2018 = vsyncadd (%p1869_p7), %s1619_s25, 4294966272  ;;  %s2933_s19 = sld [smem:[#allocation9_spill]]  ;;  %p21_p8 = scmp.ge.s32.totalorder %s2121_s11, 4  }
 0x3cf   : > { %s2934_s27 = smov %s2025_s28  ;;  %s2935_s28 = smov %s2029_s29 }
 0x3d0   : > { %s2937_s30 = smov %s2121_s11  ;;  %23 = sbr.rel (!%p21_p8) target bundleno = 5 (0x5), region = 104 }
 0x3d4   : > { %s2936_s29 = smov %s2933_s19 }
 0x3d5   :  { %1624 = vsyncpa [#allocation4], 1 }
 0x3d6   :  { %1626 = vsyncpa [#allocation4 + $0x1], 1 }
 0x3d7   :  { %1627 = vsyncpa [#allocation5], 1 }
 0x3d8   :  { %1629 = vsyncpa [#allocation5 + $0x1], 1 }

</bundles_post_ra>
